<compile_context>
chip_gen: v5e
topology: v5e:2x2
jax: 0.10.0
libtpu: 0.0.40
codegen_flags: <defaults>
</compile_context>

<pallas_src>
import functools

import jax
import jax.numpy as jnp
from jax.experimental import pallas as pl
from jax.experimental.pallas import tpu as pltpu


def _nb201_mixedop_kernel(w_ref, x_ref, bs_ref, shift_ref, inv_ref, o_ref, *, C):
    # w_ref:     (5,) f32 in SMEM   -- architecture mixture weights (only [1]=skip used here)
    # x_ref:     (TB, H, W*C)       -- batch tile, NHWC with (W, C) flattened (lane-dense)
    # bs_ref:    (3, W*C, W*C)      -- banded superkernel per vertical shift dh (arch+BN folded)
    # shift_ref: (1, W*C)           -- BN shift scaled by (w_1x1 + w_3x3), tiled over W
    # inv_ref:   (H, W*C)           -- w_avg / valid-neighbor-count, broadcast over C (lane-dense)
    # o_ref:     (TB, H, W*C)
    TB, H, WC = x_ref.shape
    x = x_ref[...]                                                  # (TB, H, WC)

    zlane = jnp.zeros((TB, H, C), jnp.float32)
    zrow = jnp.zeros((TB, 1, WC), jnp.float32)

    # ---- avg_pool_3x3 (stride 1, pad 1, count_include_pad=False), separable ----
    # horizontal: neighbors at w+1 / w-1 via C-lane shifts with zero fill
    x_wp = jnp.concatenate([x[:, :, C:], zlane], axis=2)
    x_wm = jnp.concatenate([zlane, x[:, :, :WC - C]], axis=2)
    hs = x + x_wp + x_wm
    # vertical: neighbors at h+1 / h-1 via sublane shifts with zero fill
    hs_hp = jnp.concatenate([hs[:, 1:, :], zrow], axis=1)
    hs_hm = jnp.concatenate([zrow, hs[:, :H - 1, :]], axis=1)
    out = (hs + hs_hp + hs_hm) * inv_ref[...][None]                 # w_avg folded in inv_ref

    # ---- skip_connect (identity) ----
    out = out + w_ref[1] * x

    # ---- entangled nor_conv_1x1 / nor_conv_3x3: ReLU -> 3 lane-dense banded matmuls ----
    xr = jnp.maximum(x, 0.0)                                        # shared ReLU
    xr_hp = jnp.concatenate([xr[:, 1:, :], zrow], axis=1)           # input row h+1  (dh=2)
    xr_hm = jnp.concatenate([zrow, xr[:, :H - 1, :]], axis=1)       # input row h-1  (dh=0)
    M = TB * H
    conv = jnp.dot(xr_hm.reshape(M, WC), bs_ref[0],
                   preferred_element_type=jnp.float32)
    conv = conv + jnp.dot(xr.reshape(M, WC), bs_ref[1],
                          preferred_element_type=jnp.float32)
    conv = conv + jnp.dot(xr_hp.reshape(M, WC), bs_ref[2],
                          preferred_element_type=jnp.float32)
    conv = conv + shift_ref[...]                                    # shared BN (scaled shift)
    out = out + conv.reshape(TB, H, WC)

    o_ref[...] = out.astype(o_ref.dtype)


def _pick_batch_tile(N, per_image_bytes, target_bytes=512 * 1024):
    """Batch tile: ~0.5 MB blocks, >=2 grid steps when N>=2 (v7x has 2 TCs)."""
    cap = max(1, target_bytes // max(1, per_image_bytes))
    if N >= 2:
        cap = min(cap, N // 2)
    cap = max(1, min(cap, N))
    tb = 1
    for d in range(1, cap + 1):
        if N % d == 0:
            tb = d
    return tb


def nb201_mixed_op_nhwc(x_nhwc, weights, conv3_w, bn_gamma, bn_beta, bn_mean,
                        bn_var, eps=1e-5):
    """NHWC-native entry point (preferred: no layout transposes)."""
    N, H, W, C = x_nhwc.shape
    WC = W * C
    weights = weights.astype(jnp.float32)
    x2d = x_nhwc.astype(jnp.float32).reshape(N, H, WC)

    # ---- fold arch weights (1x1 = center of 3x3) + inference-BN scale into the
    #      3x3 superkernel, then expand into lane-dense banded matrices per dh ----
    w3 = jnp.transpose(conv3_w, (2, 3, 1, 0)).astype(jnp.float32)   # (kh, kw, Cin, Cout)
    scale = bn_gamma / jnp.sqrt(bn_var + eps)
    shift = bn_beta - bn_mean * scale
    w_c1, w_c3 = weights[2], weights[3]
    weff = w_c3 * w3
    weff = weff.at[1, 1].add(w_c1 * w3[1, 1])
    weff = weff * scale[None, None, None, :]                        # (3, 3, C, C)

    def band(dh):
        # B_dh[(w_in)*C + ci, (w_out)*C + co] = weff[dh, dw, ci, co]
        # with w_in = w_out + dw - 1 (horizontal 'SAME' padding folded in).
        return sum(jnp.kron(jnp.eye(W, W, k=1 - dw, dtype=jnp.float32),
                            weff[dh, dw]) for dw in range(3))

    bs = jnp.stack([band(0), band(1), band(2)])                     # (3, WC, WC)
    shift_wc = jnp.tile(((w_c1 + w_c3) * shift)[None, :], (1, W))   # (1, WC)

    # avg-pool inverse valid counts (count_include_pad=False), w_avg folded in,
    # broadcast over C to a lane-dense (H, WC) map.
    onesp = jnp.pad(jnp.ones((H, W), jnp.float32), ((1, 1), (1, 1)))
    cnt = sum(onesp[dh:dh + H, dw:dw + W] for dh in range(3) for dw in range(3))
    inv2d = jnp.broadcast_to((weights[4] / cnt)[:, :, None],
                             (H, W, C)).reshape(H, WC)

    # NB201 stage shapes give WC a multiple of 128 and H a multiple of 8
    # (lane/sublane dense stores); other shapes are still correct, just slower.
    per_image_bytes = H * WC * 4
    TB = _pick_batch_tile(N, per_image_bytes)
    grid = (N // TB,)

    flops = 2 * N * H * WC * WC * 3 + 12 * N * H * WC
    bytes_accessed = 2 * N * H * WC * 4 + int(bs.size) * 4 + int(inv2d.size) * 4

    out2d = pl.pallas_call(
        functools.partial(_nb201_mixedop_kernel, C=C),
        out_shape=jax.ShapeDtypeStruct((N, H, WC), jnp.float32),
        grid=grid,
        in_specs=[
            pl.BlockSpec(memory_space=pltpu.MemorySpace.SMEM),       # mixture weights
            pl.BlockSpec((TB, H, WC), lambda n: (n, 0, 0)),          # batch tile of inputs
            pl.BlockSpec((3, WC, WC), lambda n: (0, 0, 0)),          # banded conv weights
            pl.BlockSpec((1, WC), lambda n: (0, 0)),                 # folded BN shift
            pl.BlockSpec((H, WC), lambda n: (0, 0)),                 # pool inv counts
        ],
        out_specs=pl.BlockSpec((TB, H, WC), lambda n: (n, 0, 0)),
        compiler_params=pltpu.CompilerParams(
            dimension_semantics=("parallel",)),
        cost_estimate=pl.CostEstimate(flops=flops, transcendentals=0,
                                      bytes_accessed=bytes_accessed),
    )(weights, x2d, bs, shift_wc, inv2d)

    return out2d.reshape(N, H, W, C)


def nb201_mixed_op(x_nchw, weights, conv3_w, bn_gamma, bn_beta, bn_mean, bn_var,
                   eps=1e-5):
    """NCHW wrapper matching the PyTorch module's layout."""
    # TODO(synk): drop these transposes by keeping the surrounding model in NHWC
    #             (each one is a full HBM read+write of the activations).
    x = jnp.transpose(x_nchw, (0, 2, 3, 1))
    out = nb201_mixed_op_nhwc(x, weights, conv3_w, bn_gamma, bn_beta, bn_mean,
                              bn_var, eps)
    return jnp.transpose(out, (0, 3, 1, 2))


def ref_forward(x_nchw, weights, conv3_w, gamma, beta, mean, var, eps=1e-5):
    """Pure-JAX reference of the same forward (for correctness check)."""
    x = jnp.transpose(x_nchw, (0, 2, 3, 1)).astype(jnp.float32)
    xr = jnp.maximum(x, 0.0)
    w3 = jnp.transpose(conv3_w, (2, 3, 1, 0)).astype(jnp.float32)
    dn = ('NHWC', 'HWIO', 'NHWC')
    y3 = jax.lax.conv_general_dilated(xr, w3, (1, 1), 'SAME', dimension_numbers=dn)
    y1 = jax.lax.conv_general_dilated(xr, w3[1:2, 1:2], (1, 1), 'SAME',
                                      dimension_numbers=dn)
    scale = gamma / jnp.sqrt(var + eps)
    shift = beta - mean * scale
    y3 = y3 * scale + shift
    y1 = y1 * scale + shift
    sums = jax.lax.reduce_window(x, 0.0, jax.lax.add, (1, 3, 3, 1), (1, 1, 1, 1), 'SAME')
    cnts = jax.lax.reduce_window(jnp.ones_like(x), 0.0, jax.lax.add,
                                 (1, 3, 3, 1), (1, 1, 1, 1), 'SAME')
    pool = sums / cnts
    out = weights[1] * x + weights[2] * y1 + weights[3] * y3 + weights[4] * pool
    return jnp.transpose(out, (0, 3, 1, 2))


if __name__ == "__main__":
    key = jax.random.PRNGKey(0)
    k1, k2, k3, k4, k5, k6, k7 = jax.random.split(key, 7)

    N, C, H, W = 4, 16, 8, 8
    x = jax.random.normal(k1, (N, C, H, W), jnp.float32)                 # NCHW input
    arch_logits = jax.random.normal(k2, (5,), jnp.float32)
    weights = jax.nn.softmax(arch_logits)                                # 5 primitives

    conv3_w = 0.1 * jax.random.normal(k3, (C, C, 3, 3), jnp.float32)     # Cout,Cin,3,3
    bn_gamma = 1.0 + 0.1 * jax.random.normal(k4, (C,), jnp.float32)
    bn_beta = 0.05 * jax.random.normal(k5, (C,), jnp.float32)
    bn_mean = 0.1 * jax.random.normal(k6, (C,), jnp.float32)
    bn_var = 0.5 + jax.random.uniform(k7, (C,), jnp.float32)

    out = nb201_mixed_op(x, weights, conv3_w, bn_gamma, bn_beta, bn_mean, bn_var)
    out = jax.block_until_ready(out)

    ref = ref_forward(x, weights, conv3_w, bn_gamma, bn_beta, bn_mean, bn_var)
    ref = jax.block_until_ready(ref)

    assert out.shape == (N, C, H, W)
    assert jnp.allclose(out, ref, atol=2e-4, rtol=2e-4), float(jnp.max(jnp.abs(out - ref)))
    print("KERNEL_OK")
</pallas_src>

<mosaic_0001>
module attributes {stable_mosaic.version = 11 : i64} {
  func.func @_nb201_mixedop_kernel(%arg0: i32, %arg1: memref<5xf32, #tpu.memory_space<smem>>, %arg2: memref<2x8x128xf32, #tpu.memory_space<vmem>>, %arg3: memref<3x128x128xf32, #tpu.memory_space<vmem>>, %arg4: memref<1x128xf32, #tpu.memory_space<vmem>>, %arg5: memref<8x128xf32, #tpu.memory_space<vmem>>, %arg6: memref<2x8x128xf32, #tpu.memory_space<vmem>>) attributes {dimension_semantics = [#tpu.dimension_semantics<parallel>], iteration_bounds = array<i64: 2>, scalar_prefetch = 0 : i64, scratch_operands = 0 : i64, tpu.core_type = #tpu.core_type<tc>, window_params = [{transform_indices = @transform_0, window_bounds = array<i64: 5>}, {transform_indices = @transform_1, window_bounds = array<i64: 2, 8, 128>}, {pipeline_mode = #tpu.pipeline_mode<synchronous>, transform_indices = @transform_2, window_bounds = array<i64: 3, 128, 128>}, {pipeline_mode = #tpu.pipeline_mode<synchronous>, transform_indices = @transform_3, window_bounds = array<i64: 1, 128>}, {pipeline_mode = #tpu.pipeline_mode<synchronous>, transform_indices = @transform_4, window_bounds = array<i64: 8, 128>}, {transform_indices = @transform_5, window_bounds = array<i64: 2, 8, 128>}]} {
    %c0 = arith.constant 0 : index
    %c0_0 = arith.constant 0 : index
    %c0_1 = arith.constant 0 : index
    %0 = vector.load %arg2[%c0, %c0_0, %c0_1] : memref<2x8x128xf32, #tpu.memory_space<vmem>>, vector<2x8x128xf32>
    %cst = arith.constant 0.000000e+00 : f32
    %1 = vector.broadcast %cst : f32 to vector<2x8x16xf32>
    %cst_2 = arith.constant 0.000000e+00 : f32
    %2 = vector.broadcast %cst_2 : f32 to vector<2x1x128xf32>
    %3 = vector.extract_strided_slice %0 {offsets = [0, 0, 16], sizes = [2, 8, 112], strides = [1, 1, 1]} : vector<2x8x128xf32> to vector<2x8x112xf32>
    %4 = tpu.concatenate %3, %1 in 2 : vector<2x8x112xf32>, vector<2x8x16xf32> -> vector<2x8x128xf32>
    %5 = vector.extract_strided_slice %0 {offsets = [0, 0, 0], sizes = [2, 8, 112], strides = [1, 1, 1]} : vector<2x8x128xf32> to vector<2x8x112xf32>
    %6 = tpu.concatenate %1, %5 in 2 : vector<2x8x16xf32>, vector<2x8x112xf32> -> vector<2x8x128xf32>
    %7 = arith.addf %0, %4 : vector<2x8x128xf32>
    %8 = arith.addf %7, %6 : vector<2x8x128xf32>
    %9 = vector.extract_strided_slice %8 {offsets = [0, 1, 0], sizes = [2, 7, 128], strides = [1, 1, 1]} : vector<2x8x128xf32> to vector<2x7x128xf32>
    %10 = tpu.concatenate %9, %2 in 1 : vector<2x7x128xf32>, vector<2x1x128xf32> -> vector<2x8x128xf32>
    %11 = vector.extract_strided_slice %8 {offsets = [0, 0, 0], sizes = [2, 7, 128], strides = [1, 1, 1]} : vector<2x8x128xf32> to vector<2x7x128xf32>
    %12 = tpu.concatenate %2, %11 in 1 : vector<2x1x128xf32>, vector<2x7x128xf32> -> vector<2x8x128xf32>
    %13 = arith.addf %8, %10 : vector<2x8x128xf32>
    %14 = arith.addf %13, %12 : vector<2x8x128xf32>
    %c0_3 = arith.constant 0 : index
    %c0_4 = arith.constant 0 : index
    %15 = vector.load %arg5[%c0_3, %c0_4] : memref<8x128xf32, #tpu.memory_space<vmem>>, vector<8x128xf32>
    %16 = vector.shape_cast %15 : vector<8x128xf32> to vector<1x8x128xf32>
    %17 = vector.broadcast %16 : vector<1x8x128xf32> to vector<2x8x128xf32>
    %18 = arith.mulf %14, %17 : vector<2x8x128xf32>
    %c1 = arith.constant 1 : index
    %19 = memref.load %arg1[%c1] : memref<5xf32, #tpu.memory_space<smem>>
    %20 = vector.broadcast %19 : f32 to vector<2x8x128xf32>
    %21 = arith.mulf %20, %0 : vector<2x8x128xf32>
    %22 = arith.addf %18, %21 : vector<2x8x128xf32>
    %cst_5 = arith.constant 0.000000e+00 : f32
    %23 = vector.broadcast %cst_5 : f32 to vector<2x8x128xf32>
    %24 = arith.maximumf %0, %23 : vector<2x8x128xf32>
    %25 = vector.extract_strided_slice %24 {offsets = [0, 1, 0], sizes = [2, 7, 128], strides = [1, 1, 1]} : vector<2x8x128xf32> to vector<2x7x128xf32>
    %26 = tpu.concatenate %25, %2 in 1 : vector<2x7x128xf32>, vector<2x1x128xf32> -> vector<2x8x128xf32>
    %27 = vector.extract_strided_slice %24 {offsets = [0, 0, 0], sizes = [2, 7, 128], strides = [1, 1, 1]} : vector<2x8x128xf32> to vector<2x7x128xf32>
    %28 = tpu.concatenate %2, %27 in 1 : vector<2x1x128xf32>, vector<2x7x128xf32> -> vector<2x8x128xf32>
    %29 = vector.shape_cast %28 : vector<2x8x128xf32> to vector<16x128xf32>
    %c0_6 = arith.constant 0 : index
    %c0_7 = arith.constant 0 : index
    %c0_8 = arith.constant 0 : index
    %30 = vector.load %arg3[%c0_6, %c0_7, %c0_8] : memref<3x128x128xf32, #tpu.memory_space<vmem>>, vector<1x128x128xf32>
    %31 = vector.shape_cast %30 : vector<1x128x128xf32> to vector<128x128xf32>
    %cst_9 = arith.constant dense<0.000000e+00> : vector<16x128xf32>
    %32 = tpu.matmul %29, %31, %cst_9 {dimension_numbers = #tpu.dot_dimension_numbers<[1], [0], [0], [1], [0, 0, 1, 1], [], []>} : vector<16x128xf32>, vector<128x128xf32>, vector<16x128xf32> -> vector<16x128xf32>
    %33 = vector.shape_cast %24 : vector<2x8x128xf32> to vector<16x128xf32>
    %c1_10 = arith.constant 1 : index
    %c0_11 = arith.constant 0 : index
    %c0_12 = arith.constant 0 : index
    %34 = vector.load %arg3[%c1_10, %c0_11, %c0_12] : memref<3x128x128xf32, #tpu.memory_space<vmem>>, vector<1x128x128xf32>
    %35 = vector.shape_cast %34 : vector<1x128x128xf32> to vector<128x128xf32>
    %cst_13 = arith.constant dense<0.000000e+00> : vector<16x128xf32>
    %36 = tpu.matmul %33, %35, %cst_13 {dimension_numbers = #tpu.dot_dimension_numbers<[1], [0], [0], [1], [0, 0, 1, 1], [], []>} : vector<16x128xf32>, vector<128x128xf32>, vector<16x128xf32> -> vector<16x128xf32>
    %37 = arith.addf %32, %36 : vector<16x128xf32>
    %38 = vector.shape_cast %26 : vector<2x8x128xf32> to vector<16x128xf32>
    %c2 = arith.constant 2 : index
    %c0_14 = arith.constant 0 : index
    %c0_15 = arith.constant 0 : index
    %39 = vector.load %arg3[%c2, %c0_14, %c0_15] : memref<3x128x128xf32, #tpu.memory_space<vmem>>, vector<1x128x128xf32>
    %40 = vector.shape_cast %39 : vector<1x128x128xf32> to vector<128x128xf32>
    %cst_16 = arith.constant dense<0.000000e+00> : vector<16x128xf32>
    %41 = tpu.matmul %38, %40, %cst_16 {dimension_numbers = #tpu.dot_dimension_numbers<[1], [0], [0], [1], [0, 0, 1, 1], [], []>} : vector<16x128xf32>, vector<128x128xf32>, vector<16x128xf32> -> vector<16x128xf32>
    %42 = arith.addf %37, %41 : vector<16x128xf32>
    %c0_17 = arith.constant 0 : index
    %c0_18 = arith.constant 0 : index
    %43 = vector.load %arg4[%c0_17, %c0_18] : memref<1x128xf32, #tpu.memory_space<vmem>>, vector<1x128xf32>
    %44 = vector.broadcast %43 : vector<1x128xf32> to vector<16x128xf32>
    %45 = arith.addf %42, %44 : vector<16x128xf32>
    %46 = vector.shape_cast %45 : vector<16x128xf32> to vector<2x8x128xf32>
    %47 = arith.addf %22, %46 : vector<2x8x128xf32>
    %c0_19 = arith.constant 0 : index
    %c0_20 = arith.constant 0 : index
    %c0_21 = arith.constant 0 : index
    %48 = vector.load %arg6[%c0_19, %c0_20, %c0_21] : memref<2x8x128xf32, #tpu.memory_space<vmem>>, vector<2x8x128xf32>
    tpu.vector_store %arg6[%c0_19, %c0_20, %c0_21], %47 {strides = array<i32>} : memref<2x8x128xf32, #tpu.memory_space<vmem>>, vector<2x8x128xf32>,
    return
  }
  func.func @transform_0(%arg0: i32) -> i32 {
    %c0_i32 = arith.constant 0 : i32
    %c0_i32_0 = arith.constant 0 : i32
    return %c0_i32 : i32
  }
  func.func @transform_1(%arg0: i32) -> (i32, i32, i32) {
    %c0_i32 = arith.constant 0 : i32
    %c0_i32_0 = arith.constant 0 : i32
    %c0_i32_1 = arith.constant 0 : i32
    return %arg0, %c0_i32, %c0_i32_0 : i32, i32, i32
  }
  func.func @transform_2(%arg0: i32) -> (i32, i32, i32) {
    %c0_i32 = arith.constant 0 : i32
    %c0_i32_0 = arith.constant 0 : i32
    %c0_i32_1 = arith.constant 0 : i32
    %c0_i32_2 = arith.constant 0 : i32
    return %c0_i32, %c0_i32_0, %c0_i32_1 : i32, i32, i32
  }
  func.func @transform_3(%arg0: i32) -> (i32, i32) {
    %c0_i32 = arith.constant 0 : i32
    %c0_i32_0 = arith.constant 0 : i32
    %c0_i32_1 = arith.constant 0 : i32
    return %c0_i32, %c0_i32_0 : i32, i32
  }
  func.func @transform_4(%arg0: i32) -> (i32, i32) {
    %c0_i32 = arith.constant 0 : i32
    %c0_i32_0 = arith.constant 0 : i32
    %c0_i32_1 = arith.constant 0 : i32
    return %c0_i32, %c0_i32_0 : i32, i32
  }
  func.func @transform_5(%arg0: i32) -> (i32, i32, i32) {
    %c0_i32 = arith.constant 0 : i32
    %c0_i32_0 = arith.constant 0 : i32
    %c0_i32_1 = arith.constant 0 : i32
    return %arg0, %c0_i32, %c0_i32_0 : i32, i32, i32
  }
}

</mosaic_0001>

<bundles_post_ra>
// kernel: tpu_custom_call.1
= control target key start
LH: loop header
LB: loop body
LE: loop exit
PB: predicated region body
PF: predicated region fallthrough
CT: control target
= control target key end

     0   :  { %10 = vsyncpa [#allocation5], 0  ;;  %s1170_s0 = inlined_call_operand.hbm [shape: f32[5], index: 0, kind: input, shape index: {}]   ;;  %s1171_s1 = inlined_call_operand.hbm [shape: f32[4,8,128], index: 1, kind: input, shape index: {}]   ;;  %s1172_s2 = inlined_call_operand.hbm [shape: f32[3,128,128], index: 2, kind: input, shape index: {}]   ;;  %s1173_s3 = inlined_call_operand.vmem [shape: f32[1,128], index: 3, kind: input, shape index: {}]   ;;  %s1174_s4 = inlined_call_operand.hbm [shape: f32[8,128], index: 4, kind: input, shape index: {}]   ;;  %s1175_s5 = inlined_call_operand.hbm [shape: f32[4,8,128], index: 5, kind: output, shape index: {}]  }
   0x1   :  { %11 = vsyncpa [#allocation3], 0 }
   0x2   :  { %13 = vsyncpa [#allocation3 + $0x1], 0 }
   0x3   :  { %14 = vsyncpa [#allocation8], 0 }
   0x4   :  { %15 = vsyncpa [#allocation4], 0 }
   0x5   :  { %17 = vsyncpa [#allocation4 + $0x1], 0  ;;  %s963_s18 = smov 0   ;;  %s965_s19 = smov 0  }
   0x6   :  { %s967_s20 = smov 0   ;;  %s969_s21 = smov 0  }
   0x7 LB: > { %s984_s22 = sadd.s32 4294967295, %s922_s21   ;;  %s614_s23 = sadd.s32 4294967294, %s922_s21   ;;  %s922_s21 = sphi %s969_s21, %s1190_s21   ;;  %s918_s20 = sphi %s967_s20, %s1189_s20   ;;  %s914_s19 = sphi %s965_s19, %s1188_s19   ;;  %s910_s18 = sphi %s963_s18, %s1187_s18  }
   0x8   : > { %p64_p0 = scmp.ne.s32.totalorder %s914_s19, %s910_s18  ;;  %p65_p1 = scmp.eq.s32.totalorder %s984_s22, 0 }
   0x9   : > { %p151_p2 = scmp.eq.s32.totalorder %s984_s22, 1  ;;  %p157_p3 = scmp.eq.s32.totalorder %s614_s23, 1 }
   0xa   : > { %p993_p4 = por %p65_p1, %p64_p0  ;;  %p615_p5 = scmp.ge.s32.totalorder %s922_s21, 1 }
   0xb   : > { %p998_p6 = por %p157_p3, %p64_p0  ;;  %p164_p7 = scmp.lt.s32.totalorder %s922_s21, 3 }
   0xc   : > { %s185_s28 = sshll.u32 %s1172_s2, 4  ;;  %s924_s30 = smov [#allocation7]   ;;  %s186_s28 = int_to_ptr.hbm [resolvable:$true] %s185_s28 }
   0xd   : > { %p1006_p8 = pnand %p615_p5, %p164_p7  ;;  %s187_s6 = sshll.u32 %s924_s30, 4  ;;  %s188_s6 = int_to_ptr.vmem [resolvable:$true] %s187_s6 }
   0xe   : > { %s176_s10 = sshll.u32 %s1170_s0, 4  ;;  %s1176_s11 = smov 128   ;;  %s177_s10 = int_to_ptr.hbm [resolvable:$true] %s176_s10 }
   0xf   : > { %p675_p9 = pneg %p1006_p8  ;;  %s926_s12 = smov 8  }
  0x10   : > { %s927_s13 = smov [#allocation2]   ;;  %s203_s16 = sshll.u32 %s1174_s4, 4  ;;  %s204_s16 = int_to_ptr.hbm [resolvable:$true] %s203_s16 }
  0x11   : > { %p1014_p10 = pnand %p675_p9, %p65_p1  ;;  %s928_s17 = smov [#allocation9]  }
  0x12   : > { %s205_s23 = sshll.u32 %s928_s17, 4  ;;  %s1035_s26 = sadd.s32 1, %s922_s21   ;;  %s206_s23 = int_to_ptr.vmem [resolvable:$true] %s205_s23 }
  0x13   : > { %681 = dma.hbm_to_vmem [thread:$0]  (!%p1014_p10), %s186_s28, 6144, %s188_s6, [#allocation8], %s1176_s11, %s1176_s11, %s926_s12  }
  0x14   : > { %678 = dma.hbm_to_smem (!%p1014_p10), %s177_s10, 16, %s927_s13, [#allocation5]  }
  0x15   : > { %684 = dma.hbm_to_vmem [thread:$0]  (!%p1014_p10), %s204_s16, 128, %s206_s23, [#allocation8]  }
  0x16   : > { %s48_s27 = ssub.s32 %s922_s21, %s1035_s26  ;;  %s51_s28 = sadd.s32 1, %s918_s20 }
  0x17   : > { %p49_p12 = scmp.eq.s32.totalorder %s48_s27, 0  ;;  %p58_p13 = scmp.ne.s32.totalorder %s918_s20, %s914_s19 }
  0x18   : > { %p59_p0 = scmp.eq.s32.totalorder %s922_s21, 0  ;;  %p696_p5 = scmp.lt.s32.totalorder %s922_s21, 2 }
  0x19   : > { %s1044_s30 = scalar_select %p49_p12, %s918_s20, %s51_s28  }
  0x1a   : > { %p1048_p3 = por %p151_p2, %p58_p13  ;;  %s216_s8 = sand.u32 1, %s918_s20  }
  0x1b   : > { %s641_s9 = sshll.u32 %s922_s21, 4  ;;  %p60_p7 = por %p59_p0, %p58_p13 }
  0x1c   : > { %s620_s7 = sshll.u32 %s216_s8, 4  ;;  %s225_s14 = scalar_lea.hbm %s1171_s1, %s641_s9 }
  0x1d   : > { %s226_s15 = sshll.u32 %s225_s14, 4  ;;  %s220_s16 = scalar_lea.vmem [#allocation6], %s620_s7  ;;  %s227_s15 = int_to_ptr.hbm [resolvable:$true] %s226_s15 }
  0x1e   : > { %s228_s17 = sshll.u32 %s220_s16, 4  ;;  %p1058_p9 = pnand %p696_p5, %p60_p7  ;;  %s229_s17 = int_to_ptr.vmem [resolvable:$true] %s228_s17 }
  0x1f   : > { %s217_s27 = scalar_lea.sflag [#allocation3], %s216_s8  ;;  %s818_s28 = sshra.s32 %s227_s15, 4  ;;  %s819_s28 = int_to_ptr.hbm [resolvable:$true] %s818_s28 }
  0x20   : > { %s820_s11 = scalar_lea.hbm %s819_s28, 16  ;;  %p822_p10 = pneg %p1058_p9 }
  0x21   : > { %p821_p2 = scmp.ne.s32.totalorder %s819_s28, %s820_s11  ;;  %s825_s7 = scalar_lea.hbm %s1171_s1, 32 }
  0x22   : > { %p826_p0 = scmp.lt.s32.totalorder %s819_s28, %s1171_s1  ;;  %p827_p5 = scmp.lt.s32.totalorder %s825_s7, %s820_s11 }
  0x23   : > { %p823_p12 = pnand %p822_p10, %p821_p2 }
  0x24   : > { %p828_p7 = por %p827_p5, %p826_p0 }
  0x25   : > { %p824_p13 = pneg %p823_p12 }
  0x27   : > { %p829_p11 = pnand %p828_p7, %p824_p13 }
  0x29   : > { %832 = shalt.err (!%p829_p11)
}
  0x2a   : > { %s1183_s8 = smov 128   ;;  %240 = sbr.rel (%p1006_p8) target bundleno = 238 (0xee), region = 40 }
  0x2b   : > { %688 = dma.hbm_to_vmem [thread:$0]  (!%p1058_p9), %s227_s15, 256, %s229_s17, %s217_s27, %s1183_s8, %s1183_s8, %s926_s12  }
  0x2f   : > { %893 = dma.done.wait (%p65_p1), [#allocation5], 16  }
  0x30   : > { %895 = vsyncadd (%p65_p1), [#allocation5], 4294967280  ;;  %s1082_s11 = sand.u32 1, %s914_s19  }
  0x31   : > { %s625_s16 = sshll.u32 %s1082_s11, 4  ;;  %s248_s23 = scalar_lea.sflag [#allocation3], %s1082_s11 }
  0x32   : > { %s1088_s12 = scalar_lea.vmem [#allocation6], %s625_s16 }
  0x33   : > { %897 = dma.done.wait (%p993_p4), %s248_s23, 256  }
  0x34   : > { %899 = vsyncadd (%p993_p4), %s248_s23, 4294967040 }
  0x35   : > { %901 = dma.done.wait (%p65_p1), [#allocation8], 6272  }
  0x36   : > { %903 = vsyncadd (%p65_p1), [#allocation8], 4294961024 }
  0x37   : > { %267 = sfence }
  0x38   : > { %v458_v0 = vld [vmem:[#allocation7 + $0x178] sm:$0xff]  ;;  %v457_v1 = vld [vmem:[#allocation7 + $0x170] sm:$0xff]  ;;  %v456_v5 = vld [vmem:[#allocation7 + $0x168] sm:$0xff]  ;;  %vm331_vm0 = vcmask 1040384   ;;  %vm324_vm1 = vcmask 1046528   ;;  %s929_s24 = smov 112  }
  0x39   : > { %v395_v2 = vld [vmem:[#allocation7 + $0xf8] sm:$0xff]  ;;  %459 = vmatpush.msra.mxu2 %v458_v0  ;;  %v394_v4 = vld [vmem:[#allocation7 + $0xf0] sm:$0xff]  ;;  %v393_v7 = vld [vmem:[#allocation7 + $0xe8] sm:$0xff]  ;;  %s930_s29 = smov 16   ;;  %vm302_vm3 = vcmask 916480   ;;  %vm311_vm4 = vcmask 130048  }
  0x3a   : > { %396 = vmatpush.msra.mxu0 %v395_v2  ;;  %v378_v3 = vld [vmem:[#allocation7 + $0x78] sm:$0xff]  ;;  %643 = vmatpush.msra.mxu3 %v395_v2  ;;  %v377_v6 = vld [vmem:[#allocation7 + $0x70] sm:$0xff]  ;;  %v376_v8 = vld [vmem:[#allocation7 + $0x68] sm:$0xff]  ;;  %s1122_s15 = sld [smem:[#allocation2 + $0x1]]  ;;  %s642_s28 = sshll.u32 %s984_s22, 4 }
  0x3b   : > { %419 = vmatpush.msra.mxu1 %v378_v3  ;;  %460 = vmatpush.msra.mxu2 %v457_v1  ;;  %v455_v9 = vld [vmem:[#allocation7 + $0x160] sm:$0xff]  ;;  %v454_v12 = vld [vmem:[#allocation7 + $0x158] sm:$0xff]  ;;  %v453_v15 = vld [vmem:[#allocation7 + $0x150] sm:$0xff]  ;;  %s506_s7 = scalar_lea.hbm %s1175_s5, %s642_s28  ;;  %s289_s13 = scalar_lea.vmem [#allocation10], %s625_s16 }
  0x3c   : > { %397 = vmatpush.msra.mxu0 %v394_v4  ;;  %644 = vmatpush.msra.mxu3 %v394_v4  ;;  %v392_v10 = vld [vmem:[#allocation7 + $0xe0] sm:$0xff]  ;;  %v391_v13 = vld [vmem:[#allocation7 + $0xd8] sm:$0xff]  ;;  %v390_v16 = vld [vmem:[#allocation7 + $0xd0] sm:$0xff]  ;;  %s507_s14 = sshll.u32 %s289_s13, 4  ;;  %s509_s22 = sshll.u32 %s506_s7, 4  ;;  %s508_s14 = int_to_ptr.vmem [resolvable:$true] %s507_s14  ;;  %s510_s22 = int_to_ptr.hbm [resolvable:$true] %s509_s22 }
  0x3d   : > { %420 = vmatpush.msra.mxu1 %v377_v6  ;;  %461 = vmatpush.msra.mxu2 %v456_v5  ;;  %v375_v11 = vld [vmem:[#allocation7 + $0x60] sm:$0xff]  ;;  %v374_v14 = vld [vmem:[#allocation7 + $0x58] sm:$0xff]  ;;  %v373_v17 = vld [vmem:[#allocation7 + $0x50] sm:$0xff]  ;;  %s495_s8 = scalar_lea.sflag [#allocation4], %s1082_s11  ;;  %s862_s23 = sshra.s32 %s510_s22, 4  ;;  %s863_s23 = int_to_ptr.hbm [resolvable:$true] %s862_s23 }
  0x3e   : > { %398 = vmatpush.msra.mxu0 %v393_v7  ;;  %645 = vmatpush.msra.mxu3 %v393_v7  ;;  %v452_v18 = vld [vmem:[#allocation7 + $0x148] sm:$0xff]  ;;  %v451_v21 = vld [vmem:[#allocation7 + $0x140] sm:$0xff]  ;;  %v450_v24 = vld [vmem:[#allocation7 + $0x138] sm:$0xff]  ;;  %p869_p11 = scmp.lt.s32.totalorder %s863_s23, %s1175_s5 }
  0x3f   : > { %421 = vmatpush.msra.mxu1 %v376_v8  ;;  %462 = vmatpush.msra.mxu2 %v455_v9  ;;  %v389_v19 = vld [vmem:[#allocation7 + $0xc8] sm:$0xff]  ;;  %v388_v22 = vld [vmem:[#allocation7 + $0xc0] sm:$0xff]  ;;  %v387_v25 = vld [vmem:[#allocation7 + $0xb8] sm:$0xff] }
  0x40   : > { %399 = vmatpush.msra.mxu0 %v392_v10  ;;  %646 = vmatpush.msra.mxu3 %v392_v10  ;;  %v372_v20 = vld [vmem:[#allocation7 + $0x48] sm:$0xff]  ;;  %v371_v23 = vld [vmem:[#allocation7 + $0x40] sm:$0xff]  ;;  %v370_v26 = vld [vmem:[#allocation7 + $0x38] sm:$0xff] }
  0x41   : > { %422 = vmatpush.msra.mxu1 %v375_v11  ;;  %463 = vmatpush.msra.mxu2 %v454_v12  ;;  %v449_v27 = vld [vmem:[#allocation7 + $0x130] sm:$0xff]  ;;  %v448_v30 = vld [vmem:[#allocation7 + $0x128] sm:$0xff]  ;;  %v447_v33 = vld [vmem:[#allocation7 + $0x120] sm:$0xff] }
  0x42   : > { %400 = vmatpush.msra.mxu0 %v391_v13  ;;  %647 = vmatpush.msra.mxu3 %v391_v13  ;;  %v386_v28 = vld [vmem:[#allocation7 + $0xb0] sm:$0xff]  ;;  %v385_v31 = vld [vmem:[#allocation7 + $0xa8] sm:$0xff]  ;;  %v384_v34 = vld [vmem:[#allocation7 + $0xa0] sm:$0xff] }
  0x43   : > { %423 = vmatpush.msra.mxu1 %v374_v14  ;;  %464 = vmatpush.msra.mxu2 %v453_v15  ;;  %v369_v29 = vld [vmem:[#allocation7 + $0x30] sm:$0xff]  ;;  %v368_v32 = vld [vmem:[#allocation7 + $0x28] sm:$0xff]  ;;  %v367_v35 = vld [vmem:[#allocation7 + $0x20] sm:$0xff] }
  0x44   : > { %401 = vmatpush.msra.mxu0 %v390_v16  ;;  %648 = vmatpush.msra.mxu3 %v390_v16  ;;  %v1099_v36 = vld [vmem:[%s1088_s12] sm:$0xff]  ;;  %v446_v37 = vld [vmem:[#allocation7 + $0x118] sm:$0xff]  ;;  %v444_v44 = vld [vmem:[#allocation7 + $0x108] sm:$0xff]  ;;  %v342_v16 = vstv %s1122_s15 }
  0x45   : > { %424 = vmatpush.msra.mxu1 %v373_v17  ;;  %465 = vmatpush.msra.mxu2 %v452_v18  ;;  %v383_v38 = vld [vmem:[#allocation7 + $0x98] sm:$0xff]  ;;  %v445_v40 = vld [vmem:[#allocation7 + $0x110] sm:$0xff]  ;;  %v347_v42 = vmax.f32 %v1099_v36, 0.0  ;;  %v381_v45 = vld [vmem:[#allocation7 + $0x88] sm:$0xff] }
  0x46   : > { %402 = vmatpush.msra.mxu0 %v389_v19  ;;  %649 = vmatpush.msra.mxu3 %v389_v19  ;;  %v366_v39 = vld [vmem:[#allocation7 + $0x18] sm:$0xff]  ;;  %v382_v41 = vld [vmem:[#allocation7 + $0x90] sm:$0xff]  ;;  %v364_v46 = vld [vmem:[#allocation7 + $0x8] sm:$0xff] }
  0x47   : > { %425 = vmatpush.msra.mxu1 %v372_v20  ;;  %466 = vmatpush.msra.mxu2 %v451_v21  ;;  %v365_v43 = vld [vmem:[#allocation7 + $0x10] sm:$0xff]  ;;  %v443_v47 = vld [vmem:[#allocation7 + $0x100] sm:$0xff]  ;;  %v351_v48 = vrot.slane %v347_v42, 1  ;;  %v1103_v50 = vld [vmem:[%s1088_s12 + $0x8] sm:$0xff]  ;;  %v357_v52 = vrot.slane %v347_v42, 7  ;;  %v343_v21 = vmul.f32 %v342_v16, %v1099_v36  ;;  %s864_s12 = scalar_lea.hbm %s863_s23, 16 }
  0x48   : > { %403 = vmatpush.msra.mxu0 %v388_v22  ;;  %650 = vmatpush.msra.mxu3 %v388_v22  ;;  %v380_v49 = vld [vmem:[#allocation7 + $0x80] sm:$0xff]  ;;  %vm1107_vm2 = vmneg %vm331_vm0  ;;  %v348_v54 = vmax.f32 %v1103_v50, 0.0  ;;  %p865_p1 = scmp.ne.s32.totalorder %s863_s23, %s864_s12 }
  0x49   : > { %426 = vmatpush.msra.mxu1 %v371_v23  ;;  %467 = vmatpush.msra.mxu2 %v450_v24  ;;  %v363_v51 = vld [vmem:[#allocation7] sm:$0xff] }
  0x4a   : > { %404 = vmatpush.msra.mxu0 %v387_v25  ;;  %651 = vmatpush.msra.mxu3 %v387_v25  ;;  %v352_v55 = vrot.slane %v348_v54, 1  ;;  %v358_v56 = vrot.slane %v348_v54, 7  ;;  %v338_v15 = vld [vmem:[#allocation9] sm:$0xff]  ;;  %p866_p4 = pnand %p865_p1, %p1048_p3 }
  0x4b   : > { %427 = vmatpush.msra.mxu1 %v370_v26  ;;  %468 = vmatpush.msra.mxu2 %v449_v27  ;;  %v742_v22 = vld [vmem:[%s1173_s3] ss:$0 sm:$0xff] }
  0x4c   : > { %405 = vmatpush.msra.mxu0 %v386_v28  ;;  %652 = vmatpush.msra.mxu3 %v386_v28  ;;  %p867_p8 = pneg %p866_p4 }
  0x4d   : > { %428 = vmatpush.msra.mxu1 %v369_v29  ;;  %469 = vmatpush.msra.mxu2 %v448_v30 }
  0x4e   : > { %406 = vmatpush.msra.mxu0 %v385_v31  ;;  %653 = vmatpush.msra.mxu3 %v385_v31 }
  0x4f   : > { %429 = vmatpush.msra.mxu1 %v368_v32  ;;  %470 = vmatpush.msra.mxu2 %v447_v33 }
  0x50   : > { %407 = vmatpush.msra.mxu0 %v384_v34  ;;  %654 = vmatpush.msra.mxu3 %v384_v34  ;;  %v344_v34 = vmul.f32 %v342_v16, %v1103_v50 }
  0x51   : > { %430 = vmatpush.msra.mxu1 %v367_v35  ;;  %471 = vmatpush.msra.mxu2 %v446_v37 }
  0x52   : > { %408 = vmatpush.msra.mxu0 %v383_v38  ;;  %655 = vmatpush.msra.mxu3 %v383_v38 }
  0x53   : > { %431 = vmatpush.msra.mxu1 %v366_v39  ;;  %472 = vmatpush.msra.mxu2 %v445_v40 }
  0x54   : > { %409 = vmatpush.msra.mxu0 %v382_v41  ;;  %656 = vmatpush.msra.mxu3 %v382_v41 }
  0x55   : > { %432 = vmatpush.msra.mxu1 %v365_v43  ;;  %473 = vmatpush.msra.mxu2 %v444_v44 }
  0x56   : > { %410 = vmatpush.msra.mxu0 %v381_v45  ;;  %296 = vrot.lane.b32.xlu0 %v1099_v36, %s929_s24 }
  0x57   : > { %433 = vmatpush.msra.mxu1 %v364_v46  ;;  %474 = vmatpush.msra.mxu2 %v443_v47 }
  0x58   : > { %657 = vmatpush.msra.mxu3 %v381_v45  ;;  %634 = vmatmul.msk.f32.vlgmr.msra.gmra.mxu2 %vm324_vm1, %v351_v48 }
  0x59   : > { %411 = vmatpush.msra.mxu0 %v380_v49  ;;  %434 = vmatpush.msra.mxu1 %v363_v51 }
  0x5a   : > { %305 = vrot.lane.b32.xlu1 %v1099_v36, %s930_s29  ;;  %412 = vmatmul.f32.vlgmr.msra.gmra.mxu0 %v347_v42 }
  0x5b   : > { %631 = vmatmul.msk.f32.vlgmr.msra.gmra.mxu1 %vm1107_vm2, %v357_v52  ;;  %658 = vmatpush.msra.mxu3 %v380_v49 }
  0x5c   : > { %415 = vmatmul.f32.vlgmr.msra.gmra.mxu3 %v348_v54 }
  0x5e   : > { %298 = vrot.lane.b32.xlu0 %v1103_v50, %s929_s24 }
  0x60   : > { %635 = vmatmul.msk.f32.gmra.mxu2 %vm324_vm1, %v352_v55 }
  0x62   : > { %307 = vrot.lane.b32.xlu1 %v1103_v50, %s930_s29  ;;  %s868_s29 = scalar_lea.hbm %s1175_s5, 32 }
  0x63   : > { %633 = vmatmul.msk.f32.gmra.mxu1 %vm1107_vm2, %v358_v56  ;;  %p870_p9 = scmp.lt.s32.totalorder %s868_s29, %s864_s12 }
  0x65   : > { %p871_p2 = por %p870_p9, %p869_p11 }
  0x67   : > { %p872_p10 = pnand %p871_p2, %p867_p8 }
  0xc8   : > { %v297_v57 = vpop.permute.xlu0 %296 }
  0xc9   : > { %v303_v58 = vsel %vm302_vm3, %v297_v57, 0.0 }
  0xca   : > { %v314_v59 = vadd.f32 %v303_v58, %v1099_v36 }
  0xcc   : > { %v306_v60 = vpop.permute.xlu1 %305 }
  0xcd   : > { %v312_v61 = vsel %vm311_vm4, 0.0, %v306_v60 }
  0xce   : > { %v316_v62 = vadd.f32 %v314_v59, %v312_v61 }
  0xd0   : > { %v320_v63 = vrot.slane %v316_v62, 1  ;;  %v327_v0 = vrot.slane %v316_v62, 7  ;;  %v299_v1 = vpop.permute.xlu0 %298 }
  0xd1   : > { %v304_v3 = vsel %vm302_vm3, %v299_v1, 0.0 }
  0xd2   : > { %v325_v2 = vsel %vm324_vm1, %v320_v63, 0.0  ;;  %v315_v5 = vadd.f32 %v304_v3, %v1103_v50  ;;  %v332_v6 = vsel %vm331_vm0, 0.0, %v327_v0 }
  0xd3   : > { %v334_v4 = vadd.f32 %v325_v2, %v316_v62 }
  0xd4   : > { %v308_v7 = vpop.permute.xlu1 %307 }
  0xd5   : > { %v313_v8 = vsel %vm311_vm4, 0.0, %v308_v7  ;;  %v336_v10 = vadd.f32 %v334_v4, %v332_v6 }
  0xd6   : > { %v317_v9 = vadd.f32 %v315_v5, %v313_v8 }
  0xd7   : > { %v413_v13 = vpop.f32.mrf.mxu0  ;;  %v339_v20 = vmul.f32 %v338_v15, %v336_v10 }
  0xd8   : > { %v321_v11 = vrot.slane %v317_v9, 1  ;;  %v328_v12 = vrot.slane %v317_v9, 7  ;;  %v436_v14 = vpop.f32.mrf.mxu1 }
  0xd9   : > { %v437_v17 = vadd.f32 %v436_v14, %v413_v13  ;;  %v345_v27 = vadd.f32 %v343_v21, %v339_v20 }
  0xda   : > { %v326_v18 = vsel %vm324_vm1, %v321_v11, 0.0  ;;  %v333_v23 = vsel %vm331_vm0, 0.0, %v328_v12 }
  0xdb   : > { %v335_v19 = vadd.f32 %v326_v18, %v317_v9  ;;  %v476_v24 = vpop.f32.mrf.mxu2 }
  0xdc   : > { %v482_v25 = vadd.f32 %v476_v24, %v437_v17 }
  0xdd   : > { %v337_v26 = vadd.f32 %v335_v19, %v333_v23 }
  0xde   : > { %v488_v28 = vadd.f32 %v742_v22, %v482_v25 }
  0xdf   : > { %v416_v29 = vpop.f32.mrf.mxu3  ;;  %v340_v33 = vmul.f32 %v338_v15, %v337_v26 }
  0xe0   : > { %v439_v30 = vpop.f32.mrf.mxu1  ;;  %v490_v31 = vadd.f32 %v488_v28, %v345_v27 }
  0xe1   : > { %v440_v32 = vadd.f32 %v439_v30, %v416_v29  ;;  %v346_v37 = vadd.f32 %v344_v34, %v340_v33 }
  0xe2   : > { %492 = vst [vmem:[%s289_s13] sm:$0xff] %v490_v31 }
  0xe3   : > { %v479_v35 = vpop.f32.mrf.mxu2 }
  0xe4   : > { %v483_v36 = vadd.f32 %v479_v35, %v440_v32 }
  0xe6   : > { %v489_v38 = vadd.f32 %v742_v22, %v483_v36 }
  0xe8   : > { %v491_v39 = vadd.f32 %v489_v38, %v346_v37 }
  0xea   : > { %493 = vst [vmem:[%s289_s13 + $0x8] sm:$0xff] %v491_v39 }
  0xeb   : > { %875 = shalt.err (!%p872_p10)
}
  0xec   : > { %s931_s11 = smov 128   ;;  %s932_s27 = smov 8  }
  0xed   : > { %673 = dma.vmem_to_hbm [thread:$0]  (%p1048_p3), %s508_s14, 256, %s510_s22, %s495_s8, %s931_s11, %s931_s11, %s932_s27  }
  0xee PF: > { %s524_s28 = sand.u32 1, %s910_s18   ;;  %p1186_p12 = scmp.ge.s32.totalorder %s922_s21, 2 }
  0xef   : > { %s525_s9 = scalar_lea.sflag [#allocation4], %s524_s28 }
  0xf0   : > { %p690_p13 = pnand %p1186_p12, %p998_p6 }
  0xf2   : > { %p691_p0 = pneg %p690_p13 }
  0xf4   : > { %905 = dma.done.wait (%p691_p0), %s525_s9, 256  }
  0xf5   : > { %907 = vsyncadd (%p691_p0), %s525_s9, 4294967040  ;;  %p20_p5 = scmp.ge.s32.totalorder %s1035_s26, 4   ;;  %s1187_s18 = smov %s914_s19 }
  0xf6   : > { %s1188_s19 = smov %s918_s20  ;;  %s1189_s20 = smov %s1044_s30 }
  0xf7   : > { %s1190_s21 = smov %s1035_s26  ;;  %22 = sbr.rel (!%p20_p5) target bundleno = 7 (0x7), region = 100 }
  0xfc   :  { %531 = vsyncpa [#allocation3], 1 }
  0xfd   :  { %533 = vsyncpa [#allocation3 + $0x1], 1 }
  0xfe   :  { %534 = vsyncpa [#allocation8], 1 }
  0xff   :  { %535 = vsyncpa [#allocation4], 1 }
 0x100   :  { %537 = vsyncpa [#allocation4 + $0x1], 1 }
 0x101   :  { %538 = vsyncpa [#allocation5], 1 }
 0x102   :  { %540 = vsyncpa [#allocation5 + $0x1], 1 }

</bundles_post_ra>
